<compile_context>
chip_gen: v7x
topology: tpu7x:2x2x1
jax: 0.10.0
libtpu: 0.0.40
codegen_flags: <defaults>
</compile_context>

<pallas_src>
import functools

import jax
import jax.numpy as jnp
from jax import lax
from jax.experimental import pallas as pl
from jax.experimental.pallas import tpu as pltpu


def _dice_kernel(pred_ref, tgt_ref, num_out, den_out, num_acc, den_acc, *,
                 num_classes, rows, exponent, ignore_index):
    n = pl.program_id(1)

    @pl.when(n == 0)
    def _():
        num_acc[...] = jnp.zeros_like(num_acc)
        den_acc[...] = jnp.zeros_like(den_acc)

    x = pred_ref[0].astype(jnp.float32)          # (C, TS, 128) one full slab/class
    t = tgt_ref[0].astype(jnp.int32)             # (TS, 128)  cast in-kernel, not wrapper
    C, TS, _ = x.shape

    # ignore_index pixels contribute nothing
    valid = t != ignore_index                    # (TS, 128) bool

    # ragged tail (static: only emitted when the row count is not a multiple of TS)
    if rows % TS != 0:
        r = n * TS + lax.broadcasted_iota(jnp.int32, (TS, 128), 0)
        in_bounds = r < rows
        valid = valid & in_bounds
        # zero OOB garbage so exp() can't poison the accumulators with NaN/Inf
        x = jnp.where(in_bounds[None, :, :], x, 0.0)

    valid_f = valid.astype(jnp.float32)

    # softmax over the class axis: axis 0 indexes whole vreg slabs, so max/sum
    # are (C-1) elementwise VPU ops (no XLU); exp + reciprocal run on the EUP.
    m = jnp.max(x, axis=0, keepdims=True)        # (1, TS, 128)
    e = jnp.exp(x - m)                           # (C, TS, 128)
    s = jnp.sum(e, axis=0, keepdims=True)        # (1, TS, 128)
    p = e * pl.reciprocal(s)                     # exact reciprocal (torch parity)

    # one-hot(target): per-class constant compare, masked by validity
    cls = lax.broadcasted_iota(jnp.int32, (C, TS, 128), 0)
    t_c = jnp.clip(t, 0, num_classes - 1)        # matches torch.clamp
    oh = ((cls == t_c[None, :, :]) & valid[None, :, :]).astype(jnp.float32)

    pm = p * valid_f[None, :, :]                 # (C, TS, 128)
    if exponent == 2:
        pm_pow = pm * pm                         # plain VPU mul, no pow
    else:
        # TODO(synk): exponent <= 0 would need a 0**e guard (module default is 2).
        pm_pow = pm ** exponent
    # one-hot ** exponent == one-hot (entries are 0/1), so den uses oh directly
    num_acc[...] += pm * oh
    den_acc[...] += pm_pow + oh

    @pl.when(n == pl.num_programs(1) - 1)
    def _():
        # one sublane reduce per BATCH (not per tile); the lane + batch reduce
        # and the dice ratio run on tiny (B, C, 128) partials in the wrapper.
        num_out[0, :, :] = jnp.sum(num_acc[...], axis=1)   # (C, 128)
        den_out[0, :, :] = jnp.sum(den_acc[...], axis=1)   # (C, 128)


def dice_loss(pred, target, *, smooth=1.0, exponent=2, loss_weight=1.0,
              ignore_index=-1):
    """pred: (B, C, H, W) float (f32 or bf16); target: (B, H, W) int. Scalar loss."""
    B, C, H, W = pred.shape
    HW = H * W

    # Free reshapes when HW % 128 == 0 (the common case).  Point order differs
    # from the torch flattening but the loss is an order-independent reduction.
    pad = (-HW) % 128
    x = pred.reshape(B, C, HW)                   # keep caller dtype (bf16 ok)
    t = target.reshape(B, HW)
    if not (jnp.issubdtype(t.dtype, jnp.integer) and t.dtype.itemsize == 4):
        # TODO(synk): keep int8/int16 labels native in the kernel to cut HBM bytes further.
        t = t.astype(jnp.int32)
    if pad:
        # TODO(synk): rare path (HW % 128 != 0) costs one extra HBM pass; padded
        # pixels are labelled ignore_index so they contribute nothing.
        x = jnp.pad(x, ((0, 0), (0, 0), (0, pad)))
        t = jnp.pad(t, ((0, 0), (0, pad)), constant_values=ignore_index)
    rows = (HW + pad) // 128
    x = x.reshape(B, C, rows, 128)
    t = t.reshape(B, rows, 128)

    # Row tile: aim for ~2 MiB per pred block (>= 512 KiB even for tiny C) so the
    # 0.35 us per-step overhead is amortized; hard-capped so the working set fits
    # comfortably on v7x's 64 MiB VMEM as well as v5e/v6e's 128 MiB.
    pred_item = jnp.dtype(pred.dtype).itemsize
    ts_cap = (2 * 1024 * 1024) // (C * 128 * pred_item)
    ts_cap = max(32, min(1024, ts_cap))
    if rows <= ts_cap:
        TS = rows                        # single tile: full-dim block, any size allowed
    else:
        TS = (ts_cap // 32) * 32         # multiple of 32: valid sublane tiling f32/bf16
    ntiles = pl.cdiv(rows, TS)

    # Right-sized VMEM request: double-buffered inputs/outputs + f32 accumulators
    # + 2x headroom for Mosaic internal scratch (never the full physical VMEM).
    work_bytes = (TS * 128 * (C * pred_item * 2 + 4 * 2)   # pred + target, x2 buffers
                  + C * TS * 128 * 4 * 2                   # f32 accumulators
                  + C * 128 * 4 * 2 * 2)                   # tiny partial outputs
    vmem_limit = int(min(40 * 1024 * 1024, max(12 * 1024 * 1024, 2 * work_bytes)))

    kernel = functools.partial(
        _dice_kernel, num_classes=C, rows=rows,
        exponent=exponent, ignore_index=int(ignore_index))

    num_part, den_part = pl.pallas_call(
        kernel,
        out_shape=(jax.ShapeDtypeStruct((B, C, 128), jnp.float32),
                   jax.ShapeDtypeStruct((B, C, 128), jnp.float32)),
        grid_spec=pltpu.PrefetchScalarGridSpec(
            num_scalar_prefetch=0,
            grid=(B, ntiles),
            in_specs=[
                # NOTE: if xprof shows exposed pred DMA at this block size, add
                # pipeline_mode=pl.Buffered(3) here (ample VMEM headroom on v5e/v6e).
                pl.BlockSpec((1, C, TS, 128), lambda b, n: (b, 0, n, 0)),
                pl.BlockSpec((1, TS, 128), lambda b, n: (b, n, 0)),
            ],
            out_specs=[
                pl.BlockSpec((1, C, 128), lambda b, n: (b, 0, 0)),
                pl.BlockSpec((1, C, 128), lambda b, n: (b, 0, 0)),
            ],
            scratch_shapes=[
                pltpu.VMEM((C, TS, 128), jnp.float32),   # numerator partials
                pltpu.VMEM((C, TS, 128), jnp.float32),   # denominator partials
            ],
        ),
        compiler_params=pltpu.CompilerParams(
            # Partials are per-batch, so the batch axis is safe to shard across the
            # two v7x TensorCores; the tile axis feeds resident accumulators.
            dimension_semantics=("parallel", "arbitrary"),
            vmem_limit_bytes=vmem_limit,
        ),
    )(x, t)

    # Tiny cross-batch / cross-lane combine + dice ratio (B*C*128 elements).
    num = jnp.sum(num_part, axis=(0, 2))                  # (C,)
    den = jnp.sum(den_part, axis=(0, 2))                  # (C,)
    dice = 1.0 - (2.0 * num + smooth) / (den + smooth)
    include = jnp.arange(C) != ignore_index               # torch loop skips i == ignore_index
    total = jnp.sum(jnp.where(include, dice, 0.0))
    return loss_weight * total / C


def _dice_loss_ref(pred, target, *, smooth=1.0, exponent=2, loss_weight=1.0,
                   ignore_index=-1):
    """Pure-JAX reference mirroring the PyTorch module (sanity check)."""
    num_classes = pred.shape[1]
    x = jnp.transpose(pred, (1, 0, 2, 3)).reshape(num_classes, -1).T
    t = target.reshape(-1).astype(jnp.int32)
    valid = (t != ignore_index).astype(jnp.float32)[:, None]
    p = jax.nn.softmax(x, axis=1)
    oh = jax.nn.one_hot(jnp.clip(t, 0, num_classes - 1), num_classes)
    pm, om = p * valid, oh * valid
    num = 2.0 * jnp.sum(pm * om, axis=0) + smooth
    den = jnp.sum(pm ** exponent + om ** exponent, axis=0) + smooth
    dice = 1.0 - num / den
    include = (jnp.arange(num_classes) != ignore_index).astype(jnp.float32)
    return loss_weight * jnp.sum(dice * include) / num_classes


if __name__ == "__main__":
    key = jax.random.PRNGKey(0)
    k1, k2 = jax.random.split(key)

    B, C, H, W = 2, 4, 16, 16
    pred = jax.random.normal(k1, (B, C, H, W), dtype=jnp.float32)
    # labels in [-1, C): includes some ignore_index (-1) entries
    target = jax.random.randint(k2, (B, H, W), -1, C, dtype=jnp.int32)

    loss = jax.block_until_ready(dice_loss(pred, target))
    ref = jax.block_until_ready(_dice_loss_ref(pred, target))
    assert jnp.allclose(loss, ref, rtol=2e-3, atol=1e-5), (loss, ref)

    print("KERNEL_OK")
</pallas_src>

<mosaic_0001>
module attributes {stable_mosaic.version = 11 : i64} {
  func.func @_dice_kernel(%arg0: i32, %arg1: i32, %arg2: memref<1x4x2x128xf32, #tpu.memory_space<vmem>>, %arg3: memref<1x2x128xi32, #tpu.memory_space<vmem>>, %arg4: memref<1x4x128xf32, #tpu.memory_space<vmem>>, %arg5: memref<1x4x128xf32, #tpu.memory_space<vmem>>, %arg6: memref<4x2x128xf32, #tpu.memory_space<vmem>>, %arg7: memref<4x2x128xf32, #tpu.memory_space<vmem>>) attributes {dimension_semantics = [#tpu.dimension_semantics<parallel>, #tpu.dimension_semantics<arbitrary>], iteration_bounds = array<i64: 2, 1>, scalar_prefetch = 0 : i64, scratch_operands = 2 : i64, tpu.core_type = #tpu.core_type<tc>, window_params = [{transform_indices = @transform_0, window_bounds = array<i64: 1, 4, 2, 128>}, {transform_indices = @transform_1, window_bounds = array<i64: 1, 2, 128>}, {transform_indices = @transform_2, window_bounds = array<i64: 1, 4, 128>}, {transform_indices = @transform_3, window_bounds = array<i64: 1, 4, 128>}]} {
    %c0_i32 = arith.constant 0 : i32
    %0 = arith.cmpi eq, %arg1, %c0_i32 : i32
    %1 = arith.extui %0 : i1 to i32
    %c0_i32_0 = arith.constant 0 : i32
    %2 = arith.cmpi ne, %1, %c0_i32_0 : i32
    scf.if %2 {
      %cst_23 = arith.constant 0.000000e+00 : f32
      %49 = vector.broadcast %cst_23 : f32 to vector<4x2x128xf32>
      %c0_24 = arith.constant 0 : index
      %c0_25 = arith.constant 0 : index
      %c0_26 = arith.constant 0 : index
      %50 = vector.load %arg6[%c0_24, %c0_25, %c0_26] : memref<4x2x128xf32, #tpu.memory_space<vmem>>, vector<4x2x128xf32>
      tpu.vector_store %arg6[%c0_24, %c0_25, %c0_26], %49 {strides = array<i32>} : memref<4x2x128xf32, #tpu.memory_space<vmem>>, vector<4x2x128xf32>,
      %cst_27 = arith.constant 0.000000e+00 : f32
      %51 = vector.broadcast %cst_27 : f32 to vector<4x2x128xf32>
      %c0_28 = arith.constant 0 : index
      %c0_29 = arith.constant 0 : index
      %c0_30 = arith.constant 0 : index
      %52 = vector.load %arg7[%c0_28, %c0_29, %c0_30] : memref<4x2x128xf32, #tpu.memory_space<vmem>>, vector<4x2x128xf32>
      tpu.vector_store %arg7[%c0_28, %c0_29, %c0_30], %51 {strides = array<i32>} : memref<4x2x128xf32, #tpu.memory_space<vmem>>, vector<4x2x128xf32>,
    } else {
    }
    %c0 = arith.constant 0 : index
    %c0_1 = arith.constant 0 : index
    %c0_2 = arith.constant 0 : index
    %c0_3 = arith.constant 0 : index
    %3 = vector.load %arg2[%c0, %c0_1, %c0_2, %c0_3] : memref<1x4x2x128xf32, #tpu.memory_space<vmem>>, vector<1x4x2x128xf32>
    %4 = vector.shape_cast %3 : vector<1x4x2x128xf32> to vector<4x2x128xf32>
    %c0_4 = arith.constant 0 : index
    %c0_5 = arith.constant 0 : index
    %c0_6 = arith.constant 0 : index
    %5 = vector.load %arg3[%c0_4, %c0_5, %c0_6] : memref<1x2x128xi32, #tpu.memory_space<vmem>>, vector<1x2x128xi32>
    %6 = vector.shape_cast %5 : vector<1x2x128xi32> to vector<2x128xi32>
    %c-1_i32 = arith.constant -1 : i32
    %7 = vector.broadcast %c-1_i32 : i32 to vector<2x128xi32>
    %8 = arith.cmpi ne, %6, %7 : vector<2x128xi32>
    %9 = arith.extui %8 : vector<2x128xi1> to vector<2x128xi32>
    %10 = arith.sitofp %9 : vector<2x128xi32> to vector<2x128xf32>
    %cst = arith.constant dense<0xFF800000> : vector<2x128xf32>
    %11 = vector.multi_reduction <maximumf>, %4, %cst [0] : vector<4x2x128xf32> to vector<2x128xf32>
    %12 = vector.shape_cast %11 : vector<2x128xf32> to vector<1x2x128xf32>
    %13 = vector.broadcast %12 : vector<1x2x128xf32> to vector<4x2x128xf32>
    %14 = arith.subf %4, %13 : vector<4x2x128xf32>
    %15 = math.exp %14 : vector<4x2x128xf32>
    %cst_7 = arith.constant dense<0.000000e+00> : vector<2x128xf32>
    %16 = vector.multi_reduction <add>, %15, %cst_7 [0] : vector<4x2x128xf32> to vector<2x128xf32>
    %17 = vector.shape_cast %16 : vector<2x128xf32> to vector<1x2x128xf32>
    %18 = tpu.reciprocal %17 : vector<1x2x128xf32> -> vector<1x2x128xf32>
    %19 = vector.broadcast %18 : vector<1x2x128xf32> to vector<4x2x128xf32>
    %20 = arith.mulf %15, %19 : vector<4x2x128xf32>
    %21 = tpu.iota {dimensions = array<i32: 0>} : vector<4x2x128xi32>
    %c0_i32_8 = arith.constant 0 : i32
    %c3_i32 = arith.constant 3 : i32
    %22 = vector.broadcast %c0_i32_8 : i32 to vector<2x128xi32>
    %23 = arith.maxsi %22, %6 : vector<2x128xi32>
    %24 = vector.broadcast %c3_i32 : i32 to vector<2x128xi32>
    %25 = arith.minsi %24, %23 : vector<2x128xi32>
    %26 = vector.shape_cast %25 : vector<2x128xi32> to vector<1x2x128xi32>
    %27 = vector.broadcast %26 : vector<1x2x128xi32> to vector<4x2x128xi32>
    %28 = arith.cmpi eq, %21, %27 : vector<4x2x128xi32>
    %29 = vector.shape_cast %8 : vector<2x128xi1> to vector<1x2x128xi1>
    %30 = vector.broadcast %29 : vector<1x2x128xi1> to vector<4x2x128xi1>
    %31 = arith.andi %28, %30 : vector<4x2x128xi1>
    %32 = arith.extui %31 : vector<4x2x128xi1> to vector<4x2x128xi32>
    %33 = arith.sitofp %32 : vector<4x2x128xi32> to vector<4x2x128xf32>
    %34 = vector.shape_cast %10 : vector<2x128xf32> to vector<1x2x128xf32>
    %35 = vector.broadcast %34 : vector<1x2x128xf32> to vector<4x2x128xf32>
    %36 = arith.mulf %20, %35 : vector<4x2x128xf32>
    %37 = arith.mulf %36, %36 : vector<4x2x128xf32>
    %c0_9 = arith.constant 0 : index
    %c0_10 = arith.constant 0 : index
    %c0_11 = arith.constant 0 : index
    %38 = vector.load %arg6[%c0_9, %c0_10, %c0_11] : memref<4x2x128xf32, #tpu.memory_space<vmem>>, vector<4x2x128xf32>
    %39 = arith.mulf %36, %33 : vector<4x2x128xf32>
    %40 = arith.addf %38, %39 : vector<4x2x128xf32>
    %c0_12 = arith.constant 0 : index
    %c0_13 = arith.constant 0 : index
    %c0_14 = arith.constant 0 : index
    %41 = vector.load %arg6[%c0_12, %c0_13, %c0_14] : memref<4x2x128xf32, #tpu.memory_space<vmem>>, vector<4x2x128xf32>
    tpu.vector_store %arg6[%c0_12, %c0_13, %c0_14], %40 {strides = array<i32>} : memref<4x2x128xf32, #tpu.memory_space<vmem>>, vector<4x2x128xf32>,
    %c0_15 = arith.constant 0 : index
    %c0_16 = arith.constant 0 : index
    %c0_17 = arith.constant 0 : index
    %42 = vector.load %arg7[%c0_15, %c0_16, %c0_17] : memref<4x2x128xf32, #tpu.memory_space<vmem>>, vector<4x2x128xf32>
    %43 = arith.addf %37, %33 : vector<4x2x128xf32>
    %44 = arith.addf %42, %43 : vector<4x2x128xf32>
    %c0_18 = arith.constant 0 : index
    %c0_19 = arith.constant 0 : index
    %c0_20 = arith.constant 0 : index
    %45 = vector.load %arg7[%c0_18, %c0_19, %c0_20] : memref<4x2x128xf32, #tpu.memory_space<vmem>>, vector<4x2x128xf32>
    tpu.vector_store %arg7[%c0_18, %c0_19, %c0_20], %44 {strides = array<i32>} : memref<4x2x128xf32, #tpu.memory_space<vmem>>, vector<4x2x128xf32>,
    %c0_i32_21 = arith.constant 0 : i32
    %46 = arith.cmpi eq, %arg1, %c0_i32_21 : i32
    %47 = arith.extui %46 : i1 to i32
    %c0_i32_22 = arith.constant 0 : i32
    %48 = arith.cmpi ne, %47, %c0_i32_22 : i32
    scf.if %48 {
      %c0_23 = arith.constant 0 : index
      %c0_24 = arith.constant 0 : index
      %c0_25 = arith.constant 0 : index
      %49 = vector.load %arg6[%c0_23, %c0_24, %c0_25] : memref<4x2x128xf32, #tpu.memory_space<vmem>>, vector<4x2x128xf32>
      %cst_26 = arith.constant dense<0.000000e+00> : vector<4x128xf32>
      %50 = vector.multi_reduction <add>, %49, %cst_26 [1] : vector<4x2x128xf32> to vector<4x128xf32>
      %c0_27 = arith.constant 0 : index
      %c0_28 = arith.constant 0 : index
      %c0_29 = arith.constant 0 : index
      %51 = vector.load %arg4[%c0_27, %c0_28, %c0_29] : memref<1x4x128xf32, #tpu.memory_space<vmem>>, vector<1x4x128xf32>
      %52 = vector.shape_cast %51 : vector<1x4x128xf32> to vector<4x128xf32>
      %53 = vector.shape_cast %50 : vector<4x128xf32> to vector<1x4x128xf32>
      tpu.vector_store %arg4[%c0_27, %c0_28, %c0_29], %53 {strides = array<i32>} : memref<1x4x128xf32, #tpu.memory_space<vmem>>, vector<1x4x128xf32>,
      %c0_30 = arith.constant 0 : index
      %c0_31 = arith.constant 0 : index
      %c0_32 = arith.constant 0 : index
      %54 = vector.load %arg7[%c0_30, %c0_31, %c0_32] : memref<4x2x128xf32, #tpu.memory_space<vmem>>, vector<4x2x128xf32>
      %cst_33 = arith.constant dense<0.000000e+00> : vector<4x128xf32>
      %55 = vector.multi_reduction <add>, %54, %cst_33 [1] : vector<4x2x128xf32> to vector<4x128xf32>
      %c0_34 = arith.constant 0 : index
      %c0_35 = arith.constant 0 : index
      %c0_36 = arith.constant 0 : index
      %56 = vector.load %arg5[%c0_34, %c0_35, %c0_36] : memref<1x4x128xf32, #tpu.memory_space<vmem>>, vector<1x4x128xf32>
      %57 = vector.shape_cast %56 : vector<1x4x128xf32> to vector<4x128xf32>
      %58 = vector.shape_cast %55 : vector<4x128xf32> to vector<1x4x128xf32>
      tpu.vector_store %arg5[%c0_34, %c0_35, %c0_36], %58 {strides = array<i32>} : memref<1x4x128xf32, #tpu.memory_space<vmem>>, vector<1x4x128xf32>,
    } else {
    }
    return
  }
  func.func @transform_0(%arg0: i32, %arg1: i32) -> (i32, i32, i32, i32) {
    %c0_i32 = arith.constant 0 : i32
    %c0_i32_0 = arith.constant 0 : i32
    %c0_i32_1 = arith.constant 0 : i32
    return %arg0, %c0_i32, %arg1, %c0_i32_0 : i32, i32, i32, i32
  }
  func.func @transform_1(%arg0: i32, %arg1: i32) -> (i32, i32, i32) {
    %c0_i32 = arith.constant 0 : i32
    %c0_i32_0 = arith.constant 0 : i32
    return %arg0, %arg1, %c0_i32 : i32, i32, i32
  }
  func.func @transform_2(%arg0: i32, %arg1: i32) -> (i32, i32, i32) {
    %c0_i32 = arith.constant 0 : i32
    %c0_i32_0 = arith.constant 0 : i32
    %c0_i32_1 = arith.constant 0 : i32
    return %arg0, %c0_i32, %c0_i32_0 : i32, i32, i32
  }
  func.func @transform_3(%arg0: i32, %arg1: i32) -> (i32, i32, i32) {
    %c0_i32 = arith.constant 0 : i32
    %c0_i32_0 = arith.constant 0 : i32
    %c0_i32_1 = arith.constant 0 : i32
    return %arg0, %c0_i32, %c0_i32_0 : i32, i32, i32
  }
}

</mosaic_0001>

<bundles_post_ra>
// kernel: tpu_custom_call.1
= control target key start
LH: loop header
LB: loop body
LE: loop exit
PB: predicated region body
PF: predicated region fallthrough
CT: control target
= control target key end

     0   :  { %9 = vsyncpa [#allocation5], 0  ;;  %s1239_s0 = inlined_call_operand.hbm [shape: f32[2,4,2,128], index: 0, kind: input, shape index: {}]   ;;  %s1240_s1 = inlined_call_operand.hbm [shape: s32[2,2,128], index: 1, kind: input, shape index: {}]   ;;  %s1241_s2 = inlined_call_operand.hbm [shape: f32[2,4,128], index: 2, kind: output, shape index: {0}]   ;;  %s1242_s3 = inlined_call_operand.hbm [shape: f32[2,4,128], index: 3, kind: output, shape index: {1}]  }
   0x1   :  { %11 = vsyncpa [#allocation5 + $0x1], 0 }
   0x2   :  { %12 = vsyncpa [#allocation8], 0 }
   0x3   :  { %14 = vsyncpa [#allocation8 + $0x1], 0 }
   0x4   :  { %15 = vsyncpa [#allocation6], 0 }
   0x5   :  { %17 = vsyncpa [#allocation6 + $0x1], 0 }
   0x6   :  { %18 = vsyncpa [#allocation11], 0 }
   0x7   :  { %20 = vsyncpa [#allocation11 + $0x1], 0  ;;  %s942_s12 = smov 0   ;;  %s944_s13 = smov 0  }
   0x8   :  { %s946_s14 = smov 0   ;;  %s948_s15 = smov 0  }
   0x9   :  { %s950_s16 = smov 0   ;;  %s952_s17 = smov 0  }
   0xa LB: > { %s624_s18 = sadd.s32 4294967295, %s913_s17   ;;  %s625_s19 = sadd.s32 4294967294, %s913_s17   ;;  %s913_s17 = sphi %s952_s17, %s26_s17   ;;  %s909_s16 = sphi %s950_s16, %s1261_s16   ;;  %s905_s15 = sphi %s948_s15, %s1260_s15   ;;  %s901_s14 = sphi %s946_s14, %s1259_s14   ;;  %s897_s13 = sphi %s944_s13, %s1258_s13   ;;  %s893_s12 = sphi %s942_s12, %s1257_s12  }
   0xb   : > { %s38_s20 = sadd.s32 1, %s909_s16  ;;  %s47_s21 = sadd.s32 1, %s901_s14 }
   0xc   : > { %p40_p0 = scmp.ge.s32.totalorder %s38_s20, 2  ;;  %p54_p1 = scmp.ne.s32.totalorder %s901_s14, %s897_s13 }
   0xd   : > { %p55_p2 = scmp.eq.s32.totalorder %s913_s17, 0  ;;  %p60_p3 = scmp.ne.s32.totalorder %s897_s13, %s893_s12 }
   0xe   : > { %s1263_s20 = smov (%p40_p0, %s38_s20), 0  ;;  %p61_p5 = scmp.eq.s32.totalorder %s624_s18, 0 }
   0xf   : > { %p983_p4 = por %p55_p2, %p54_p1  ;;  %s42_s23 = ssub.s32 %s909_s16, %s1263_s20 }
  0x10   : > { %p112_p6 = scmp.eq.s32.totalorder %s624_s18, 1  ;;  %p45_p7 = scmp.eq.s32.totalorder %s42_s23, 0 }
  0x11   : > { %p989_p8 = por %p61_p5, %p60_p3  ;;  %p118_p10 = scmp.eq.s32.totalorder %s625_s19, 1 }
  0x12   : > { %p993_p9 = por %p112_p6, %p54_p1  ;;  %p672_p13 = scmp.lt.s32.totalorder %s913_s17, 2 }
  0x13   : > { %s1246_s24 = scalar_select %p989_p8, 1, 0 }
  0x14   : > { %s1247_s25 = scalar_select %p993_p9, 1, 0 }
  0x15   : > { %s998_s26 = scalar_select %p45_p7, %s901_s14, %s47_s21  }
  0x16   : > { %p1000_p11 = por %p118_p10, %p60_p3  ;;  %s1007_s28 = sand.u32 1, %s901_s14  }
  0x17   : > { %s628_s29 = sshll.u32 %s1007_s28, 3  ;;  %s649_s30 = sshll.u32 %s909_s16, 7 }
  0x18   : > { %s1248_s27 = scalar_select %p1000_p11, 1, 0 }
  0x19   : > { %s1014_s6 = scalar_lea.hbm %s1239_s0, %s649_s30  ;;  %s168_s7 = scalar_lea.vmem [#allocation4], %s628_s29 }
  0x1a   : > { %s176_s8 = sshll.u32 %s168_s7, 4  ;;  %p1020_p0 = pnand %p672_p13, %p983_p4  ;;  %s1016_s8 = int_to_ptr.vmem [resolvable:$true] %s176_s8 }
  0x1b   : > { %s165_s10 = scalar_lea.sflag [#allocation5], %s1007_s28  ;;  %s735_s11 = scalar_lea.hbm %s1014_s6, 128 }
  0x1c   : > { %p736_p2 = scmp.ne.s32.totalorder %s1014_s6, %s735_s11  ;;  %p737_p3 = pneg %p1020_p0 }
  0x1d   : > { %s740_s21 = scalar_lea.hbm %s1239_s0, 256  ;;  %p741_p4 = scmp.lt.u32.totalorder %s1014_s6, %s1239_s0 }
  0x1e   : > { %p738_p5 = pnand %p737_p3, %p736_p2  ;;  %p742_p7 = scmp.lt.u32.totalorder %s740_s21, %s735_s11 }
  0x1f   : > { %p744_p13 = scmp.lt.u32.totalorder %s735_s11, %s1014_s6 }
  0x20   : > { %p739_p6 = pneg %p738_p5  ;;  %p743_p10 = por %p742_p7, %p741_p4 }
  0x22   : > { %p745_p12 = por %p744_p13, %p743_p10 }
  0x24   : > { %p746_p1 = pnand %p745_p12, %p739_p6 }
  0x26   : > { %749 = shalt.err (!%p746_p1)
}
  0x27   : > { %s750_s29 = scalar_lea.vmem %s1016_s8, 128  ;;  %s915_s30 = smov [#allocation4]  }
  0x28   : > { %p751_p2 = scmp.ne.s32.totalorder %s1016_s8, %s750_s29  ;;  %s755_s4 = sshll.u32 %s915_s30, 4  ;;  %s756_s4 = int_to_ptr.vmem [resolvable:$false] %s755_s4 }
  0x29   : > { %s757_s5 = scalar_lea.vmem %s756_s4, 256  ;;  %p758_p9 = scmp.lt.s32.totalorder %s1016_s8, %s756_s4 }
  0x2a   : > { %p753_p5 = pnand %p751_p2, %p737_p3  ;;  %p759_p4 = scmp.lt.s32.totalorder %s757_s5, %s750_s29 }
  0x2c   : > { %p754_p11 = pneg %p753_p5  ;;  %p760_p7 = por %p759_p4, %p758_p9 }
  0x2e   : > { %p761_p10 = pnand %p760_p7, %p754_p11 }
  0x30   : > { %764 = shalt.err (!%p761_p10)
}
  0x31   : > { %s916_s7 = smov 32   ;;  %s917_s11 = smov 2  }
  0x32   : > { %661 = dma.hbm_to_vmem [thread:$0]  (!%p1020_p0), %s1014_s6, 128, %s1016_s8, %s165_s10, %s916_s7, %s916_s7, %s917_s11  }
  0x33   : > { %p203_p12 = scmp.lt.s32.totalorder %s913_s17, 3  ;;  %s631_s18 = sshll.u32 %s1007_s28, 1 }
  0x34   : > { %s632_s19 = sshll.u32 %s909_s16, 5  ;;  %p1250_p9 = scmp.ge.s32.totalorder %s913_s17, 1 }
  0x35   : > { %s1065_s29 = scalar_lea.hbm %s1240_s1, %s632_s19  ;;  %s190_s30 = scalar_lea.vmem [#allocation7], %s631_s18 }
  0x36   : > { %p1058_p11 = pnand %p1250_p9, %p203_p12  ;;  %s198_s4 = sshll.u32 %s190_s30, 4  ;;  %s199_s4 = int_to_ptr.vmem [resolvable:$true] %s198_s4 }
  0x37   : > { %s187_s6 = scalar_lea.sflag [#allocation8], %s1007_s28  ;;  %s765_s8 = scalar_lea.hbm %s1065_s29, 32 }
  0x38   : > { %s1251_s21 = scalar_select %p1058_p11, 1, 0 }
  0x39   : > { %p766_p1 = scmp.ne.s32.totalorder %s1065_s29, %s765_s8  ;;  %s770_s7 = scalar_lea.hbm %s1240_s1, 64 }
  0x3a   : > { %p771_p2 = scmp.lt.u32.totalorder %s1065_s29, %s1240_s1  ;;  %p772_p5 = scmp.lt.u32.totalorder %s770_s7, %s765_s8 }
  0x3b   : > { %p768_p6 = pnand %p766_p1, %p737_p3  ;;  %p774_p7 = scmp.lt.u32.totalorder %s765_s8, %s1065_s29 }
  0x3c   : > { %p773_p4 = por %p772_p5, %p771_p2 }
  0x3d   : > { %p769_p13 = pneg %p768_p6 }
  0x3e   : > { %p775_p10 = por %p774_p7, %p773_p4 }
  0x40   : > { %p776_p12 = pnand %p775_p10, %p769_p13 }
  0x42   : > { %779 = shalt.err (!%p776_p12)
}
  0x43   : > { %s780_s28 = scalar_lea.vmem %s199_s4, 32  ;;  %s918_s18 = smov [#allocation7]  }
  0x44   : > { %p781_p9 = scmp.ne.s32.totalorder %s199_s4, %s780_s28  ;;  %s785_s22 = sshll.u32 %s918_s18, 4  ;;  %s786_s22 = int_to_ptr.vmem [resolvable:$false] %s785_s22 }
  0x45   : > { %s787_s23 = scalar_lea.vmem %s786_s22, 64  ;;  %p788_p8 = scmp.lt.s32.totalorder %s199_s4, %s786_s22 }
  0x46   : > { %p783_p1 = pnand %p781_p9, %p737_p3  ;;  %p789_p11 = scmp.lt.s32.totalorder %s787_s23, %s780_s28 }
  0x48   : > { %p784_p6 = pneg %p783_p1  ;;  %p790_p2 = por %p789_p11, %p788_p8 }
  0x4a   : > { %p791_p5 = pnand %p790_p2, %p784_p6 }
  0x4c   : > { %794 = shalt.err (!%p791_p5)
}
  0x4d   : > { %664 = dma.hbm_to_vmem [thread:$0]  (!%p1020_p0), %s1065_s29, 32, %s199_s4, %s187_s6  }
  0x4e   : > { %p1252_p13 = scmp.ne.s32.totalorder %s1251_s21, 0 }
  0x4f   : > { %s1090_s30 = sand.u32 (!%p1252_p13), 1, %s897_s13   ;;  %p1253_p3 = scmp.ne.s32.totalorder (!%p1252_p13), %s1246_s24, 0 }
  0x50   : > { %207 = sbr.rel (%p1252_p13) target bundleno = 205 (0xcd), region = 28  ;;  %s634_s8 = sshll.u32 (!%p1252_p13), %s1090_s30, 3 }
  0x51   : > { %s210_s10 = scalar_lea.sflag (!%p1252_p13), [#allocation5], %s1090_s30  ;;  %s213_s5 = scalar_lea.vmem (!%p1252_p13), [#allocation4], %s634_s8 }
  0x57   : > { %876 = dma.done.wait (%p1253_p3), %s210_s10, 128  }
  0x58   : > { %878 = vsyncadd (%p1253_p3), %s210_s10, 4294967168  ;;  %s635_s9 = sshll.u32 %s1090_s30, 1  ;;  %s219_s21 = scalar_lea.sflag [#allocation8], %s1090_s30 }
  0x59   : > { %s1100_s29 = scalar_lea.vmem [#allocation7], %s635_s9 }
  0x5a   : > { %880 = dma.done.wait (%p1253_p3), %s219_s21, 32  }
  0x5b   : > { %882 = vsyncadd (%p1253_p3), %s219_s21, 4294967264  ;;  %v919_v0 = vmov 0.0   ;;  %vm275_vm0 = vcmask 1041408   ;;  %v267_v1 = vld [vmem:[%s213_s5] sm:$0x3]  ;;  %vm407_vm12 = vcmask 1041409  }
  0x5c   : > { %259 = vst [vmem:[#allocation2] sm:$0x3] %v919_v0  ;;  %260 = vst [vmem:[#allocation2 + $0x2] sm:$0x3] %v919_v0  ;;  %v268_v2 = vld [vmem:[%s213_s5 + $0x2] sm:$0x3] }
  0x5d   : > { %261 = vst [vmem:[#allocation2 + $0x4] sm:$0x3] %v919_v0  ;;  %262 = vst [vmem:[#allocation2 + $0x6] sm:$0x3] %v919_v0  ;;  %v269_v3 = vld [vmem:[%s213_s5 + $0x4] sm:$0x3] }
  0x5e   : > { %263 = vst [vmem:[#allocation3] sm:$0x3] %v919_v0  ;;  %264 = vst [vmem:[#allocation3 + $0x2] sm:$0x3] %v919_v0  ;;  %v270_v4 = vld [vmem:[%s213_s5 + $0x6] sm:$0x3] }
  0x5f   : > { %265 = vst [vmem:[#allocation3 + $0x4] sm:$0x3] %v919_v0  ;;  %266 = vst [vmem:[#allocation3 + $0x6] sm:$0x3] %v919_v0  ;;  %v276_v5 = vsel %vm275_vm0, %v267_v1, -inf  ;;  %v277_v6 = vsel %vm275_vm0, %v268_v2, -inf }
  0x60   : > { %v278_v7 = vsel %vm275_vm0, %v269_v3, -inf  ;;  %v279_v8 = vsel %vm275_vm0, %v270_v4, -inf  ;;  %v280_v9 = vmax.f32 %v276_v5, %v277_v6  ;;  %v271_v20 = vld [vmem:[%s1100_s29] sm:$0x3]  ;;  %vm409_vm13 = vcmask 1042434   ;;  %s636_s24 = sshll.u32 %s1090_s30, 2 }
  0x61   : > { %v281_v10 = vmax.f32 %v278_v7, %v279_v8  ;;  %vm307_vm1 = vcmp.gt.s32.totalorder %v271_v20, 0  ;;  %vm272_vm3 = vcmp.ne.s32.totalorder %v271_v20, 4294967295  ;;  %s247_s4 = scalar_lea.vmem [#allocation9], %s636_s24  ;;  %s645_s7 = sshll.u32 %s905_s15, 6  ;;  %vm411_vm14 = vcmask 1043459  }
  0x62   : > { %v308_v29 = vsel %vm307_vm1, %v271_v20, 0  ;;  %v638_v35 = vsel %vm272_vm3, 1.0, %v919_v0  ;;  %s475_s6 = sshll.u32 %s247_s4, 4  ;;  %s1149_s28 = scalar_lea.hbm %s1241_s2, %s645_s7  ;;  %s1141_s6 = int_to_ptr.vmem [resolvable:$true] %s475_s6 }
  0x63   : > { %v282_v11 = vmax.f32 %v280_v9, %v281_v10  ;;  %vm309_vm2 = vcmp.lt.s32.totalorder %v308_v29, 3  ;;  %v336_v45 = vld [vmem:[#allocation2] sm:$0x3]  ;;  %v337_v49 = vld [vmem:[#allocation2 + $0x2] sm:$0x3]  ;;  %s1154_s18 = scalar_lea.vmem [#allocation10], %s636_s24 }
  0x64   : > { %v310_v33 = vsel %vm309_vm2, %v308_v29, 3  ;;  %v338_v50 = vld [vmem:[#allocation2 + $0x4] sm:$0x3]  ;;  %v339_v51 = vld [vmem:[#allocation2 + $0x6] sm:$0x3]  ;;  %s488_s22 = sshll.u32 %s1154_s18, 4  ;;  %s1183_s22 = int_to_ptr.vmem [resolvable:$true] %s488_s22 }
  0x65   : > { %v283_v12 = vsub.f32 %v267_v1, %v282_v11  ;;  %v284_v13 = vsub.f32 %v268_v2, %v282_v11  ;;  %v285_v14 = vsub.f32 %v269_v3, %v282_v11  ;;  %v286_v15 = vsub.f32 %v270_v4, %v282_v11  ;;  %v352_v57 = vld [vmem:[#allocation3] sm:$0x3]  ;;  %v353_v1 = vld [vmem:[#allocation3 + $0x2] sm:$0x3]  ;;  %s457_s23 = scalar_lea.sflag [#allocation6], %s1090_s30  ;;  %s795_s8 = scalar_lea.vmem %s1141_s6, 64 }
  0x66   : > { %vm311_vm4 = vcmp.eq.s32.totalorder %v310_v33, 0  ;;  %vm312_vm5 = vcmp.eq.s32.totalorder %v310_v33, 1  ;;  %vm313_vm6 = vcmp.eq.s32.totalorder %v310_v33, 2  ;;  %vm314_vm8 = vcmp.eq.s32.totalorder %v310_v33, 3  ;;  %v354_v2 = vld [vmem:[#allocation3 + $0x4] sm:$0x3]  ;;  %p796_p8 = scmp.ne.s32.totalorder %s1141_s6, %s795_s8 }
  0x67   : > { %v287_v16 = vmul.f32 1.442695, %v283_v12  ;;  %v289_v17 = vmul.f32 1.442695, %v284_v13  ;;  %v291_v18 = vmul.f32 1.442695, %v285_v14  ;;  %vm316_vm7 = vmand %vm311_vm4, %vm272_vm3 }
  0x68   : > { %v293_v19 = vmul.f32 1.442695, %v286_v15  ;;  %vm317_vm9 = vmand %vm312_vm5, %vm272_vm3  ;;  %v639_v40 = vsel %vm316_vm7, 1.0, %v919_v0  ;;  %v355_v3 = vld [vmem:[#allocation3 + $0x6] sm:$0x3]  ;;  %p1254_p0 = scmp.ne.s32.totalorder %s1247_s25, 0 }
  0x69   : > { %725 = vpow2.f32 %v287_v16  ;;  %vm318_vm10 = vmand %vm313_vm6, %vm272_vm3  ;;  %v640_v41 = vsel %vm317_vm9, 1.0, %v919_v0  ;;  %s920_s10 = smov [#allocation9]  }
  0x6a   : > { %727 = vpow2.f32 %v289_v17  ;;  %vm319_vm11 = vmand %vm314_vm8, %vm272_vm3  ;;  %v641_v42 = vsel %vm318_vm10, 1.0, %v919_v0  ;;  %p797_p11 = pnand %p796_p8, %p1254_p0  ;;  %s799_s5 = sshll.u32 %s920_s10, 4  ;;  %s800_s5 = int_to_ptr.vmem [resolvable:$false] %s799_s5 }
  0x6b   : > { %729 = vpow2.f32 %v291_v18  ;;  %v642_v43 = vsel %vm319_vm11, 1.0, %v919_v0  ;;  %s801_s9 = scalar_lea.vmem %s800_s5, 128  ;;  %p802_p7 = scmp.lt.s32.totalorder %s1141_s6, %s800_s5 }
  0x6c   : > { %731 = vpow2.f32 %v293_v19  ;;  %p798_p4 = pneg %p797_p11  ;;  %p803_p10 = scmp.lt.s32.totalorder %s801_s9, %s795_s8 }
  0x6e   : > { %p804_p12 = por %p803_p10, %p802_p7 }
  0x70   : > { %p805_p9 = pnand %p804_p12, %p798_p4 }
  0x73   : > { %v726_v21 = vpop.eup %725 }
  0x74   : > { %v728_v22 = vpop.eup %727  ;;  %v295_v23 = vsel %vm275_vm0, %v726_v21, 0.0 }
  0x75   : > { %v730_v24 = vpop.eup %729  ;;  %v296_v25 = vsel %vm275_vm0, %v728_v22, 0.0 }
  0x76   : > { %v732_v26 = vpop.eup %731  ;;  %v297_v27 = vadd.f32 %v296_v25, %v295_v23  ;;  %v298_v28 = vsel %vm275_vm0, %v730_v24, 0.0 }
  0x77   : > { %v300_v30 = vsel %vm275_vm0, %v732_v26, 0.0 }
  0x78   : > { %v299_v31 = vadd.f32 %v298_v28, %v297_v27 }
  0x7a   : > { %v301_v32 = vadd.f32 %v300_v30, %v299_v31 }
  0x7c   : > { %733 = vrcp.f32 %v301_v32 }
  0x86   : > { %v734_v34 = vpop.eup %733 }
  0x87   : > { %v303_v36 = vmul.f32 %v734_v34, %v726_v21  ;;  %v304_v37 = vmul.f32 %v734_v34, %v728_v22  ;;  %v305_v38 = vmul.f32 %v734_v34, %v730_v24  ;;  %v306_v39 = vmul.f32 %v734_v34, %v732_v26 }
  0x89   : > { %v328_v44 = vmul.f32 %v638_v35, %v303_v36  ;;  %v329_v46 = vmul.f32 %v638_v35, %v304_v37  ;;  %v330_v47 = vmul.f32 %v638_v35, %v305_v38  ;;  %v331_v48 = vmul.f32 %v638_v35, %v306_v39 }
  0x8b   : > { %v340_v52 = vmul.f32 %v639_v40, %v328_v44  ;;  %v341_v53 = vmul.f32 %v640_v41, %v329_v46  ;;  %v342_v54 = vmul.f32 %v641_v42, %v330_v47  ;;  %v343_v55 = vmul.f32 %v642_v43, %v331_v48 }
  0x8c   : > { %v332_v56 = vmul.f32 %v328_v44, %v328_v44  ;;  %v333_v58 = vmul.f32 %v329_v46, %v329_v46  ;;  %v334_v59 = vmul.f32 %v330_v47, %v330_v47  ;;  %v335_v60 = vmul.f32 %v331_v48, %v331_v48 }
  0x8d   : > { %v344_v61 = vadd.f32 %v340_v52, %v336_v45  ;;  %v345_v62 = vadd.f32 %v341_v53, %v337_v49  ;;  %v346_v63 = vadd.f32 %v342_v54, %v338_v50  ;;  %v347_v0 = vadd.f32 %v343_v55, %v339_v51 }
  0x8e   : > { %v356_v4 = vadd.f32 %v639_v40, %v332_v56  ;;  %v357_v5 = vadd.f32 %v640_v41, %v333_v58  ;;  %v358_v6 = vadd.f32 %v641_v42, %v334_v59  ;;  %v359_v7 = vadd.f32 %v642_v43, %v335_v60 }
  0x8f   : > { %348 = vst [vmem:[#allocation2] sm:$0x3] %v344_v61  ;;  %349 = vst [vmem:[#allocation2 + $0x2] sm:$0x3] %v345_v62 }
  0x90   : > { %350 = vst [vmem:[#allocation2 + $0x4] sm:$0x3] %v346_v63  ;;  %351 = vst [vmem:[#allocation2 + $0x6] sm:$0x3] %v347_v0  ;;  %v360_v8 = vadd.f32 %v356_v4, %v352_v57  ;;  %v361_v9 = vadd.f32 %v357_v5, %v353_v1  ;;  %v362_v10 = vadd.f32 %v358_v6, %v354_v2 }
  0x91   : > { %v363_v11 = vadd.f32 %v359_v7, %v355_v3 }
  0x92   : > { %364 = vst [vmem:[#allocation3] sm:$0x3] %v360_v8  ;;  %365 = vst [vmem:[#allocation3 + $0x2] sm:$0x3] %v361_v9 }
  0x93   : > { %366 = vst [vmem:[#allocation3 + $0x4] sm:$0x3] %v362_v10  ;;  %367 = vst [vmem:[#allocation3 + $0x6] sm:$0x3] %v363_v11 }
  0x96   : > { %v371_v12 = vld [vmem:[#allocation2] sm:$0x3]  ;;  %v372_v13 = vld [vmem:[#allocation2 + $0x2] sm:$0x3] }
  0x97   : > { %v373_v14 = vld [vmem:[#allocation2 + $0x4] sm:$0x3]  ;;  %v374_v15 = vld [vmem:[#allocation2 + $0x6] sm:$0x3]  ;;  %v375_v16 = vsel %vm275_vm0, %v371_v12, 0.0  ;;  %v382_v17 = vsel %vm275_vm0, %v372_v13, 0.0 }
  0x98   : > { %v389_v18 = vsel %vm275_vm0, %v373_v14, 0.0  ;;  %v376_v19 = vrot.slane %v375_v16, 4  ;;  %v383_v20 = vrot.slane %v382_v17, 4  ;;  %v396_v22 = vsel %vm275_vm0, %v374_v15, 0.0 }
  0x99   : > { %v390_v21 = vrot.slane %v389_v18, 4  ;;  %v397_v23 = vrot.slane %v396_v22, 4  ;;  %v415_v24 = vld [vmem:[#allocation3] sm:$0x3]  ;;  %v416_v25 = vld [vmem:[#allocation3 + $0x2] sm:$0x3] }
  0x9a   : > { %v377_v26 = vadd.f32 %v376_v19, %v375_v16  ;;  %v384_v27 = vadd.f32 %v383_v20, %v382_v17  ;;  %v417_v29 = vld [vmem:[#allocation3 + $0x4] sm:$0x3]  ;;  %v418_v30 = vld [vmem:[#allocation3 + $0x6] sm:$0x3]  ;;  %v419_v31 = vsel %vm275_vm0, %v415_v24, 0.0  ;;  %v426_v34 = vsel %vm275_vm0, %v416_v25, 0.0 }
  0x9b   : > { %v391_v28 = vadd.f32 %v390_v21, %v389_v18  ;;  %v398_v32 = vadd.f32 %v397_v23, %v396_v22  ;;  %v420_v33 = vrot.slane %v419_v31, 4  ;;  %v433_v35 = vsel %vm275_vm0, %v417_v29, 0.0 }
  0x9c   : > { %v378_v36 = vrot.slane %v377_v26, 2  ;;  %v385_v37 = vrot.slane %v384_v27, 2  ;;  %v427_v39 = vrot.slane %v426_v34, 4  ;;  %v434_v42 = vrot.slane %v433_v35, 4 }
  0x9d   : > { %v392_v38 = vrot.slane %v391_v28, 2  ;;  %v399_v40 = vrot.slane %v398_v32, 2  ;;  %v421_v41 = vadd.f32 %v420_v33, %v419_v31  ;;  %v440_v43 = vsel %vm275_vm0, %v418_v30, 0.0 }
  0x9e   : > { %v379_v44 = vadd.f32 %v378_v36, %v377_v26  ;;  %v386_v45 = vadd.f32 %v385_v37, %v384_v27  ;;  %v428_v47 = vadd.f32 %v427_v39, %v426_v34  ;;  %v435_v50 = vadd.f32 %v434_v42, %v433_v35 }
  0x9f   : > { %v393_v46 = vadd.f32 %v392_v38, %v391_v28  ;;  %v400_v48 = vadd.f32 %v399_v40, %v398_v32  ;;  %v422_v49 = vrot.slane %v421_v41, 2  ;;  %v441_v51 = vrot.slane %v440_v43, 4 }
  0xa0   : > { %v380_v52 = vrot.slane %v379_v44, 1  ;;  %v387_v53 = vrot.slane %v386_v45, 1  ;;  %v429_v55 = vrot.slane %v428_v47, 2  ;;  %v436_v58 = vrot.slane %v435_v50, 2 }
  0xa1   : > { %v394_v54 = vrot.slane %v393_v46, 1  ;;  %v401_v56 = vrot.slane %v400_v48, 1  ;;  %v423_v57 = vadd.f32 %v422_v49, %v421_v41  ;;  %v442_v59 = vadd.f32 %v441_v51, %v440_v43 }
  0xa2   : > { %v381_v60 = vadd.f32 %v380_v52, %v379_v44  ;;  %v388_v61 = vadd.f32 %v387_v53, %v386_v45  ;;  %v430_v63 = vadd.f32 %v429_v55, %v428_v47  ;;  %v437_v1 = vadd.f32 %v436_v58, %v435_v50 }
  0xa3   : > { %v395_v62 = vadd.f32 %v394_v54, %v393_v46  ;;  %v424_v0 = vrot.slane %v423_v57, 1  ;;  %v443_v2 = vrot.slane %v442_v59, 2  ;;  %v402_v3 = vadd.f32 %v401_v56, %v400_v48 }
  0xa4   : > { %v408_v4 = vsel %vm407_vm12, %v388_v61, %v381_v60  ;;  %v431_v5 = vrot.slane %v430_v63, 1  ;;  %v438_v8 = vrot.slane %v437_v1, 1 }
  0xa5   : > { %v410_v6 = vsel %vm409_vm13, %v395_v62, %v408_v4  ;;  %v425_v7 = vadd.f32 %v424_v0, %v423_v57  ;;  %v444_v9 = vadd.f32 %v443_v2, %v442_v59 }
  0xa6   : > { %v412_v10 = vsel %vm411_vm14, %v402_v3, %v410_v6  ;;  %v432_v11 = vadd.f32 %v431_v5, %v430_v63  ;;  %v439_v12 = vadd.f32 %v438_v8, %v437_v1 }
  0xa7   : > { %414 = vst [vmem:[%s247_s4] sm:$0xf] %v412_v10  ;;  %v445_v13 = vrot.slane %v444_v9, 1 }
  0xa8   : > { %v451_v14 = vsel %vm407_vm12, %v432_v11, %v425_v7 }
  0xa9   : > { %808 = shalt.err (!%p805_p9)
}
  0xaa   : > { %s809_s21 = scalar_lea.hbm %s1149_s28, 64  ;;  %s813_s4 = scalar_lea.hbm %s1241_s2, 128 }
  0xab   : > { %p810_p1 = scmp.ne.s32.totalorder %s1149_s28, %s809_s21  ;;  %p814_p5 = scmp.lt.u32.totalorder %s1149_s28, %s1241_s2 }
  0xac   : > { %p815_p13 = scmp.lt.u32.totalorder %s813_s4, %s809_s21  ;;  %p817_p8 = scmp.lt.u32.totalorder %s809_s21, %s1149_s28 }
  0xad   : > { %p811_p6 = pnand %p810_p1, %p1254_p0 }
  0xae   : > { %p816_p3 = por %p815_p13, %p814_p5 }
  0xaf   : > { %p812_p2 = pneg %p811_p6 }
  0xb0   : > { %p818_p11 = por %p817_p8, %p816_p3 }
  0xb2   : > { %p819_p4 = pnand %p818_p11, %p812_p2 }
  0xb4   : > { %822 = shalt.err (!%p819_p4)
}
  0xb5   : > { %654 = dma.vmem_to_hbm [thread:$0]  (%p1254_p0), %s1141_s6, 64, %s1149_s28, %s457_s23   ;;  %v446_v15 = vadd.f32 %v445_v13, %v444_v9  ;;  %v452_v16 = vsel %vm409_vm13, %v439_v12, %v451_v14 }
  0xb6   : > { %s1190_s5 = scalar_lea.hbm %s1242_s3, %s645_s7  ;;  %s462_s9 = scalar_lea.sflag [#allocation11], %s1090_s30 }
  0xb7   : > { %v453_v17 = vsel %vm411_vm14, %v446_v15, %v452_v16  ;;  %s823_s6 = scalar_lea.vmem %s1183_s22, 64  ;;  %s921_s28 = smov [#allocation10]  }
  0xb8   : > { %455 = vst [vmem:[%s1154_s18] sm:$0xf] %v453_v17  ;;  %p824_p7 = scmp.ne.s32.totalorder %s1183_s22, %s823_s6  ;;  %s827_s23 = sshll.u32 %s921_s28, 4  ;;  %s828_s23 = int_to_ptr.vmem [resolvable:$false] %s827_s23 }
  0xb9   : > { %s829_s15 = scalar_lea.vmem %s828_s23, 128  ;;  %p830_p9 = scmp.lt.s32.totalorder %s1183_s22, %s828_s23 }
  0xba   : > { %p825_p10 = pnand %p824_p7, %p1254_p0  ;;  %p831_p1 = scmp.lt.s32.totalorder %s829_s15, %s823_s6 }
  0xbc   : > { %p826_p12 = pneg %p825_p10  ;;  %p832_p6 = por %p831_p1, %p830_p9 }
  0xbe   : > { %p833_p2 = pnand %p832_p6, %p826_p12 }
  0xc0   : > { %836 = shalt.err (!%p833_p2)
}
  0xc1   : > { %s837_s30 = scalar_lea.hbm %s1190_s5, 64  ;;  %s841_s21 = scalar_lea.hbm %s1242_s3, 128 }
  0xc2   : > { %p838_p5 = scmp.ne.s32.totalorder %s1190_s5, %s837_s30  ;;  %p842_p8 = scmp.lt.u32.totalorder %s1190_s5, %s1242_s3 }
  0xc3   : > { %p843_p11 = scmp.lt.u32.totalorder %s841_s21, %s837_s30  ;;  %p845_p7 = scmp.lt.u32.totalorder %s837_s30, %s1190_s5 }
  0xc4   : > { %p839_p13 = pnand %p838_p5, %p1254_p0 }
  0xc5   : > { %p844_p4 = por %p843_p11, %p842_p8 }
  0xc6   : > { %p840_p3 = pneg %p839_p13 }
  0xc7   : > { %p846_p10 = por %p845_p7, %p844_p4 }
  0xc9   : > { %p847_p12 = pnand %p846_p10, %p840_p3 }
  0xcb   : > { %850 = shalt.err (!%p847_p12)
}
  0xcc   : > { %655 = dma.vmem_to_hbm [thread:$0]  (%p1254_p0), %s1183_s22, 64, %s1190_s5, %s462_s9  }
  0xcd PF: > { %s500_s4 = sand.u32 1, %s893_s12   ;;  %p1255_p9 = scmp.ne.s32.totalorder %s1248_s27, 0 }
  0xce   : > { %p1256_p1 = scmp.ge.s32.totalorder %s913_s17, 2  ;;  %s501_s11 = scalar_lea.sflag [#allocation6], %s500_s4 }
  0xd0   : > { %p666_p6 = pnand %p1256_p1, %p1255_p9 }
  0xd2   : > { %884 = dma.done.wait (!%p666_p6), %s501_s11, 64  }
  0xd3   : > { %886 = vsyncadd (!%p666_p6), %s501_s11, 4294967232  ;;  %s510_s19 = scalar_lea.sflag [#allocation11], %s500_s4 }
  0xd4   : > { %888 = dma.done.wait (!%p666_p6), %s510_s19, 64  }
  0xd5   : > { %890 = vsyncadd (!%p666_p6), %s510_s19, 4294967232  ;;  %s26_s17 = sadd.s32 1, %s913_s17   ;;  %s1257_s12 = smov %s897_s13 }
  0xd6   : > { %p23_p2 = scmp.ge.s32.totalorder %s26_s17, 4   ;;  %s1258_s13 = smov %s901_s14 }
  0xd7   : > { %s1259_s14 = smov %s998_s26  ;;  %s1260_s15 = smov %s909_s16 }
  0xd8   : > { %s1261_s16 = smov %s1263_s20  ;;  %25 = sbr.rel (!%p23_p2) target bundleno = 10 (0xa), region = 111 }
  0xdf   :  { %515 = vsyncpa [#allocation5], 1 }
  0xe0   :  { %517 = vsyncpa [#allocation5 + $0x1], 1 }
  0xe1   :  { %518 = vsyncpa [#allocation8], 1 }
  0xe2   :  { %520 = vsyncpa [#allocation8 + $0x1], 1 }
  0xe3   :  { %521 = vsyncpa [#allocation6], 1 }
  0xe4   :  { %523 = vsyncpa [#allocation6 + $0x1], 1 }
  0xe5   :  { %524 = vsyncpa [#allocation11], 1 }
  0xe6   :  { %526 = vsyncpa [#allocation11 + $0x1], 1 }

</bundles_post_ra>
